<compile_context>
chip_gen: v6e
topology: v6e:2x2x1
jax: 0.10.0
libtpu: 0.0.40
codegen_flags: <defaults>
</compile_context>

<pallas_src>
import functools

import jax
import jax.numpy as jnp
from jax import lax
from jax.experimental import pallas as pl
from jax.experimental.pallas import tpu as pltpu

INPUT_DIM = 9      # len(cols)
HIDDEN_DIM = 12
OUTPUT_DIM = 2

_RC = 512          # rows per inner chunk; bounds in-kernel temporaries


def _round_up(n, m):
    return ((n + m - 1) // m) * m


def _mlp_kernel(x_ref, w1_ref, b1_ref, w2_ref, b2_ref, w3_ref, b3_ref, o_ref, *, rc):
    """3-layer MLP over one (TB, INPUT_DIM) batch tile.

    x_ref : (TB, IN)   input rows (f32 or bf16; cast to f32 in-register)
    w*_ref: (in, out)  weights, b*_ref: (1, out) biases -- f32, VMEM-resident
    o_ref : (TB, OUT)  f32 logits
    """
    # Load the tiny weights/biases once per tile (loop-invariant).
    w1 = w1_ref[...]
    b1 = b1_ref[...]
    w2 = w2_ref[...]
    b2 = b2_ref[...]
    w3 = w3_ref[...]
    b3 = b3_ref[...]

    n_chunks = x_ref.shape[0] // rc

    def body(c, carry):
        off = pl.multiple_of(c * rc, rc)
        # f32 compute throughout; the streaming dtype only affects HBM traffic.
        xc = x_ref[pl.ds(off, rc), :].astype(jnp.float32)
        h1 = jnp.dot(xc, w1, preferred_element_type=jnp.float32) + b1
        h1 = jnp.maximum(h1, 0.0)
        h2 = jnp.dot(h1, w2, preferred_element_type=jnp.float32) + b2
        h2 = jnp.maximum(h2, 0.0)
        out = jnp.dot(h2, w3, preferred_element_type=jnp.float32) + b3
        o_ref[pl.ds(off, rc), :] = out.astype(o_ref.dtype)
        return carry

    lax.fori_loop(0, n_chunks, body, 0)


def _choose_tile(batch, block_b):
    """Pick the batch-tile size TB (multiple of 8, multiple of _RC when big)."""
    if batch <= _RC:
        # Tiny batch: one small step; per-step overhead dominates regardless.
        return _round_up(batch, 8)
    # Big batch: aim for >= 2 roughly equal tiles (keeps v7x megacore busy),
    # capped at block_b; both candidates are multiples of _RC.
    return max(_RC, min(block_b, _round_up(pl.cdiv(batch, 2), _RC)))


def net_forward(x, params, *, block_b=8192):
    """Run the 3-layer MLP in a single batch-tiled Pallas kernel.

    x: (B, INPUT_DIM) float32 or bfloat16 rows (streamed as-is, no wrapper copy).
    params: torch-layout weights: w (out_features, in_features), b (out_features,).
    block_b: max rows per grid step (normalized to a multiple of 512). The
      default keeps the double-buffered VMEM footprint ~20 MiB, safe on v7x's
      64 MiB VMEM; it can be raised on v5e/v6e (128 MiB VMEM).
    Returns (B, OUTPUT_DIM) float32 logits.
    """
    if x.ndim != 2 or x.shape[1] != INPUT_DIM:
        raise ValueError(f"expected x of shape (B, {INPUT_DIM}), got {x.shape}")
    B = x.shape[0]

    # Normalize the tile request so it can never violate (8, 128) tiling.
    block_b = max(_RC, (int(block_b) // _RC) * _RC)

    TB = _choose_tile(B, block_b)
    rc = min(_RC, TB)                    # TB is always a multiple of rc
    grid_n = pl.cdiv(B, TB)              # ragged final tile handled by Pallas

    # Only the tiny (<=12x12) weights get wrapper layout work: transpose to
    # (in, out) so the kernel contracts the feature axis with plain jnp.dot.
    w1 = params["w1"].T.astype(jnp.float32)
    w2 = params["w2"].T.astype(jnp.float32)
    w3 = params["w3"].T.astype(jnp.float32)
    b1 = params["b1"].reshape(1, HIDDEN_DIM).astype(jnp.float32)
    b2 = params["b2"].reshape(1, HIDDEN_DIM).astype(jnp.float32)
    b3 = params["b3"].reshape(1, OUTPUT_DIM).astype(jnp.float32)

    # Scoped-VMEM budget: x/out tiles are lane-padded to 128 in VMEM and
    # double-buffered; add headroom and keep well under v7x's 64 MiB physical.
    lane = 128
    x_itemsize = jnp.dtype(x.dtype).itemsize
    vmem_need = (2 * TB * lane * x_itemsize   # x tile, double-buffered
                 + 2 * TB * lane * 4          # out tile, double-buffered
                 + 8 * rc * lane * 4          # per-chunk intermediates
                 + (1 << 20))                 # weights/biases + slack
    vmem_limit = int(min(max(vmem_need + (4 << 20), 16 << 20), 112 << 20))

    def _const(shape):
        return pl.BlockSpec(shape, lambda i: (0, 0))

    out = pl.pallas_call(
        functools.partial(_mlp_kernel, rc=rc),
        out_shape=jax.ShapeDtypeStruct((B, OUTPUT_DIM), jnp.float32),
        grid=(grid_n,),
        in_specs=[
            pl.BlockSpec((TB, INPUT_DIM), lambda i: (i, 0)),
            _const(w1.shape), _const(b1.shape),
            _const(w2.shape), _const(b2.shape),
            _const(w3.shape), _const(b3.shape),
        ],
        out_specs=pl.BlockSpec((TB, OUTPUT_DIM), lambda i: (i, 0)),
        compiler_params=pltpu.CompilerParams(
            dimension_semantics=("parallel",),
            vmem_limit_bytes=vmem_limit),
    )(x, w1, b1, w2, b2, w3, b3)
    return out


def init_params(key):
    """Deterministic init mimicking nn.Linear default (uniform +-1/sqrt(fan_in)).

    Weights stored in torch layout (out_features, in_features); biases (out_features,).
    """
    ks = jax.random.split(key, 6)

    def linear(kw, kb, fan_in, fan_out):
        bound = 1.0 / jnp.sqrt(float(fan_in))
        w = jax.random.uniform(kw, (fan_out, fan_in), jnp.float32, -bound, bound)
        b = jax.random.uniform(kb, (fan_out,), jnp.float32, -bound, bound)
        return w, b

    w1, b1 = linear(ks[0], ks[1], INPUT_DIM, HIDDEN_DIM)
    w2, b2 = linear(ks[2], ks[3], HIDDEN_DIM, HIDDEN_DIM)
    w3, b3 = linear(ks[4], ks[5], HIDDEN_DIM, OUTPUT_DIM)
    return {"w1": w1, "b1": b1, "w2": w2, "b2": b2, "w3": w3, "b3": b3}


def net_forward_ref(x, p):
    """Pure-JAX reference (matches the PyTorch forward)."""
    x = x.astype(jnp.float32)
    h = jnp.maximum(x @ p["w1"].T + p["b1"], 0.0)
    h = jnp.maximum(h @ p["w2"].T + p["b2"], 0.0)
    return h @ p["w3"].T + p["b3"]


if __name__ == "__main__":
    key = jax.random.PRNGKey(0)
    k_params, k_x, k_x2 = jax.random.split(key, 3)

    params = init_params(k_params)

    # Small demo batch of (B, 9) feature rows, matching the module interface.
    batch = 8
    x = jax.random.normal(k_x, (batch, INPUT_DIM), dtype=jnp.float32)
    ref = net_forward_ref(x, params)

    out = jax.block_until_ready(net_forward(x, params))
    assert out.shape == (batch, OUTPUT_DIM), out.shape
    assert jnp.allclose(out, ref, atol=1e-4, rtol=1e-4), "f32 mismatch vs reference"

    # Multi-step grid + ragged final tile (batch not a multiple of the tile).
    batch2 = 777
    x2 = jax.random.normal(k_x2, (batch2, INPUT_DIM), dtype=jnp.float32)
    ref2 = net_forward_ref(x2, params)
    out2 = jax.block_until_ready(net_forward(x2, params, block_b=512))
    assert out2.shape == (batch2, OUTPUT_DIM), out2.shape
    assert jnp.allclose(out2, ref2, atol=1e-4, rtol=1e-4), "tiled f32 mismatch vs reference"

    # bf16 input stream (caller-provided); weights/activations stay f32 in-kernel.
    out_bf16 = jax.block_until_ready(net_forward(x.astype(jnp.bfloat16), params))
    assert out_bf16.shape == (batch, OUTPUT_DIM), out_bf16.shape
    assert jnp.allclose(out_bf16, ref, atol=5e-2, rtol=5e-2), "bf16 mismatch vs reference"

    print("KERNEL_OK")
</pallas_src>

<mosaic_0001>
module attributes {stable_mosaic.version = 11 : i64} {
  func.func @_mlp_kernel(%arg0: i32, %arg1: memref<8x9xf32, #tpu.memory_space<vmem>>, %arg2: memref<9x12xf32, #tpu.memory_space<vmem>>, %arg3: memref<1x12xf32, #tpu.memory_space<vmem>>, %arg4: memref<12x12xf32, #tpu.memory_space<vmem>>, %arg5: memref<1x12xf32, #tpu.memory_space<vmem>>, %arg6: memref<12x2xf32, #tpu.memory_space<vmem>>, %arg7: memref<1x2xf32, #tpu.memory_space<vmem>>, %arg8: memref<8x2xf32, #tpu.memory_space<vmem>>) attributes {dimension_semantics = [#tpu.dimension_semantics<parallel>], iteration_bounds = array<i64: 1>, scalar_prefetch = 0 : i64, scratch_operands = 0 : i64, tpu.core_type = #tpu.core_type<tc>, window_params = [{transform_indices = @transform_0, window_bounds = array<i64: 8, 9>}, {pipeline_mode = #tpu.pipeline_mode<synchronous>, transform_indices = @transform_1, window_bounds = array<i64: 9, 12>}, {pipeline_mode = #tpu.pipeline_mode<synchronous>, transform_indices = @transform_2, window_bounds = array<i64: 1, 12>}, {pipeline_mode = #tpu.pipeline_mode<synchronous>, transform_indices = @transform_3, window_bounds = array<i64: 12, 12>}, {pipeline_mode = #tpu.pipeline_mode<synchronous>, transform_indices = @transform_4, window_bounds = array<i64: 1, 12>}, {pipeline_mode = #tpu.pipeline_mode<synchronous>, transform_indices = @transform_5, window_bounds = array<i64: 12, 2>}, {pipeline_mode = #tpu.pipeline_mode<synchronous>, transform_indices = @transform_6, window_bounds = array<i64: 1, 2>}, {transform_indices = @transform_7, window_bounds = array<i64: 8, 2>}]} {
    %c0 = arith.constant 0 : index
    %c0_0 = arith.constant 0 : index
    %0 = vector.load %arg2[%c0, %c0_0] : memref<9x12xf32, #tpu.memory_space<vmem>>, vector<9x12xf32>
    %c0_1 = arith.constant 0 : index
    %c0_2 = arith.constant 0 : index
    %1 = vector.load %arg3[%c0_1, %c0_2] : memref<1x12xf32, #tpu.memory_space<vmem>>, vector<1x12xf32>
    %c0_3 = arith.constant 0 : index
    %c0_4 = arith.constant 0 : index
    %2 = vector.load %arg4[%c0_3, %c0_4] : memref<12x12xf32, #tpu.memory_space<vmem>>, vector<12x12xf32>
    %c0_5 = arith.constant 0 : index
    %c0_6 = arith.constant 0 : index
    %3 = vector.load %arg5[%c0_5, %c0_6] : memref<1x12xf32, #tpu.memory_space<vmem>>, vector<1x12xf32>
    %c0_7 = arith.constant 0 : index
    %c0_8 = arith.constant 0 : index
    %4 = vector.load %arg6[%c0_7, %c0_8] : memref<12x2xf32, #tpu.memory_space<vmem>>, vector<12x2xf32>
    %c0_9 = arith.constant 0 : index
    %c0_10 = arith.constant 0 : index
    %5 = vector.load %arg7[%c0_9, %c0_10] : memref<1x2xf32, #tpu.memory_space<vmem>>, vector<1x2xf32>
    %c0_i32 = arith.constant 0 : i32
    %c8_i32 = arith.constant 8 : i32
    %6 = arith.muli %c0_i32, %c8_i32 : i32
    %7 = tpu.assume_multiple %6, 8 : i32
    %8 = arith.index_cast %7 : i32 to index
    %c0_11 = arith.constant 0 : index
    %9 = vector.load %arg1[%8, %c0_11] : memref<8x9xf32, #tpu.memory_space<vmem>>, vector<8x9xf32>
    %cst = arith.constant dense<0.000000e+00> : vector<8x12xf32>
    %10 = tpu.matmul %9, %0, %cst {dimension_numbers = #tpu.dot_dimension_numbers<[1], [0], [0], [1], [0, 0, 1, 1], [], []>} : vector<8x9xf32>, vector<9x12xf32>, vector<8x12xf32> -> vector<8x12xf32>
    %11 = vector.broadcast %1 : vector<1x12xf32> to vector<8x12xf32>
    %12 = arith.addf %10, %11 : vector<8x12xf32>
    %cst_12 = arith.constant 0.000000e+00 : f32
    %13 = vector.broadcast %cst_12 : f32 to vector<8x12xf32>
    %14 = arith.maximumf %12, %13 : vector<8x12xf32>
    %cst_13 = arith.constant dense<0.000000e+00> : vector<8x12xf32>
    %15 = tpu.matmul %14, %2, %cst_13 {dimension_numbers = #tpu.dot_dimension_numbers<[1], [0], [0], [1], [0, 0, 1, 1], [], []>} : vector<8x12xf32>, vector<12x12xf32>, vector<8x12xf32> -> vector<8x12xf32>
    %16 = vector.broadcast %3 : vector<1x12xf32> to vector<8x12xf32>
    %17 = arith.addf %15, %16 : vector<8x12xf32>
    %cst_14 = arith.constant 0.000000e+00 : f32
    %18 = vector.broadcast %cst_14 : f32 to vector<8x12xf32>
    %19 = arith.maximumf %17, %18 : vector<8x12xf32>
    %cst_15 = arith.constant dense<0.000000e+00> : vector<8x2xf32>
    %20 = tpu.matmul %19, %4, %cst_15 {dimension_numbers = #tpu.dot_dimension_numbers<[1], [0], [0], [1], [0, 0, 1, 1], [], []>} : vector<8x12xf32>, vector<12x2xf32>, vector<8x2xf32> -> vector<8x2xf32>
    %21 = vector.broadcast %5 : vector<1x2xf32> to vector<8x2xf32>
    %22 = arith.addf %20, %21 : vector<8x2xf32>
    %23 = arith.index_cast %7 : i32 to index
    %c0_16 = arith.constant 0 : index
    %24 = vector.load %arg8[%23, %c0_16] : memref<8x2xf32, #tpu.memory_space<vmem>>, vector<8x2xf32>
    tpu.vector_store %arg8[%23, %c0_16], %22 {strides = array<i32>} : memref<8x2xf32, #tpu.memory_space<vmem>>, vector<8x2xf32>,
    %c1_i32 = arith.constant 1 : i32
    return
  }
  func.func @transform_0(%arg0: i32) -> (i32, i32) {
    %c0_i32 = arith.constant 0 : i32
    %c0_i32_0 = arith.constant 0 : i32
    return %arg0, %c0_i32 : i32, i32
  }
  func.func @transform_1(%arg0: i32) -> (i32, i32) {
    %c0_i32 = arith.constant 0 : i32
    %c0_i32_0 = arith.constant 0 : i32
    %c0_i32_1 = arith.constant 0 : i32
    return %c0_i32, %c0_i32_0 : i32, i32
  }
  func.func @transform_2(%arg0: i32) -> (i32, i32) {
    %c0_i32 = arith.constant 0 : i32
    %c0_i32_0 = arith.constant 0 : i32
    %c0_i32_1 = arith.constant 0 : i32
    return %c0_i32, %c0_i32_0 : i32, i32
  }
  func.func @transform_3(%arg0: i32) -> (i32, i32) {
    %c0_i32 = arith.constant 0 : i32
    %c0_i32_0 = arith.constant 0 : i32
    %c0_i32_1 = arith.constant 0 : i32
    return %c0_i32, %c0_i32_0 : i32, i32
  }
  func.func @transform_4(%arg0: i32) -> (i32, i32) {
    %c0_i32 = arith.constant 0 : i32
    %c0_i32_0 = arith.constant 0 : i32
    %c0_i32_1 = arith.constant 0 : i32
    return %c0_i32, %c0_i32_0 : i32, i32
  }
  func.func @transform_5(%arg0: i32) -> (i32, i32) {
    %c0_i32 = arith.constant 0 : i32
    %c0_i32_0 = arith.constant 0 : i32
    %c0_i32_1 = arith.constant 0 : i32
    return %c0_i32, %c0_i32_0 : i32, i32
  }
  func.func @transform_6(%arg0: i32) -> (i32, i32) {
    %c0_i32 = arith.constant 0 : i32
    %c0_i32_0 = arith.constant 0 : i32
    %c0_i32_1 = arith.constant 0 : i32
    return %c0_i32, %c0_i32_0 : i32, i32
  }
  func.func @transform_7(%arg0: i32) -> (i32, i32) {
    %c0_i32 = arith.constant 0 : i32
    %c0_i32_0 = arith.constant 0 : i32
    return %arg0, %c0_i32 : i32, i32
  }
}

</mosaic_0001>

<bundles_post_ra>
// kernel: tpu_custom_call.1
= control target key start
LH: loop header
LB: loop body
LE: loop exit
PB: predicated region body
PF: predicated region fallthrough
CT: control target
= control target key end

     0   :  { %12 = vsyncpa [#allocation3], 0  ;;  %s487_s0 = inlined_call_operand.hbm [shape: f32[8,9], index: 0, kind: input, shape index: {}]   ;;  %s488_s1 = inlined_call_operand.vmem [shape: f32[9,12], index: 1, kind: input, shape index: {}]   ;;  %s489_s2 = inlined_call_operand.vmem [shape: f32[1,12], index: 2, kind: input, shape index: {}]   ;;  %s490_s3 = inlined_call_operand.hbm [shape: f32[12,12], index: 3, kind: input, shape index: {}]   ;;  %s491_s4 = inlined_call_operand.vmem [shape: f32[1,12], index: 4, kind: input, shape index: {}]   ;;  %s492_s5 = inlined_call_operand.vmem [shape: f32[12,2], index: 5, kind: input, shape index: {}]   ;;  %s493_s6 = inlined_call_operand.vmem [shape: f32[1,2], index: 6, kind: input, shape index: {}]   ;;  %s494_s7 = inlined_call_operand.vmem [shape: f32[8,2], index: 7, kind: output, shape index: {}]  }
   0x1   :  { %13 = vsyncpa [#allocation5], 0  ;;  %s411_s24 = smov [#allocation2]   ;;  %s412_s26 = smov [#allocation4]  }
   0x2   :  { %s20_s25 = sshll.u32 %s411_s24, 4  ;;  %s33_s27 = sshll.u32 %s412_s26, 4  ;;  %s21_s25 = int_to_ptr.vmem [resolvable:$true] %s20_s25  ;;  %s34_s27 = int_to_ptr.vmem [resolvable:$true] %s33_s27 }
   0x3   :  { %s375_s28 = scalar_lea.vmem %s21_s25, 128  ;;  %p380_p1 = scmp.lt.s32.totalorder %s21_s25, %s21_s25 }
   0x4   :  { %p376_p0 = scmp.ne.s32.totalorder %s21_s25, %s375_s28  ;;  %p381_p2 = scmp.lt.s32.totalorder %s375_s28, %s375_s28 }
   0x6   :  { %p382_p3 = por %p381_p2, %p380_p1 }
   0x8   :  { %p383_p4 = pnand %p382_p3, %p376_p0 }
   0xa   :  { %386 = shalt.err (!%p383_p4)
}
   0xb   :  { %23 = dma.hbm_to_vmem [thread:$0]  %s487_s0, 128, %s21_s25, [#allocation3]  }
   0xc   :  { %s395_s8 = scalar_lea.vmem %s34_s27, 256  ;;  %p400_p6 = scmp.lt.s32.totalorder %s34_s27, %s34_s27 }
   0xd   :  { %p396_p5 = scmp.ne.s32.totalorder %s34_s27, %s395_s8  ;;  %p401_p7 = scmp.lt.s32.totalorder %s395_s8, %s395_s8 }
   0xf   :  { %p402_p8 = por %p401_p7, %p400_p6 }
  0x11   :  { %p403_p9 = pnand %p402_p8, %p396_p5 }
  0x13   :  { %406 = shalt.err (!%p403_p9)
}
  0x14   :  { %s413_s9 = smov 128   ;;  %s414_s10 = smov 8  }
  0x15   :  { %39 = dma.hbm_to_vmem [thread:$0]  %s490_s3, 256, %s34_s27, [#allocation5], %s413_s9, %s413_s9, %s414_s10  }
  0x16   :  { %407 = dma.done.wait [#allocation3], 128  }
  0x17   :  { %408 = vsyncadd [#allocation3], 4294967168 }
  0x18   :  { %409 = dma.done.wait [#allocation5], 256  }
  0x19   :  { %410 = vsyncadd [#allocation5], 4294967040  ;;  %v415_v0 = vmov 0.0   ;;  %vm416_vm0 = vmmov 0   ;;  %vm72_vm1 = vcmask 1040384   ;;  %v52_v2 = vld [vmem:[%s488_s1] sm:$0xff] }
  0x1a   :  { %340 = vmatprep.subr.mxu0 %v415_v0  ;;  %344 = vmatprep.mubr.msk.f32.mxu0 %vm416_vm0, %v415_v0  ;;  %v53_v1 = vld [vmem:[%s488_s1 + $0x8] sm:$0x1]  ;;  %v61_v3 = vld [vmem:[#allocation2] sm:$0xff]  ;;  %vm68_vm2 = vcmask 72704   ;;  %v56_v4 = vld [vmem:[#allocation4 + $0x8] sm:$0xf] }
  0x1b   :  { %347 = vmatprep.subr.mxu1 %v415_v0  ;;  %351 = vmatprep.mubr.msk.f32.mxu1 %vm416_vm0, %v415_v0  ;;  %vm157_vm3 = vcmask 1043456   ;;  %v55_v5 = vld [vmem:[#allocation4] sm:$0xff]  ;;  %v322_v6 = vld [vmem:[%s489_s2] ss:$0 sm:$0xff]  ;;  %vm153_vm4 = vcmask 97280   ;;  %vm314_vm5 = vcmask 15360  }
  0x1c   :  { %341 = vmatpush3.msk.msra.mxu0 %vm72_vm1, %v53_v1  ;;  %348 = vmatpush3.msk.msra.mxu1 %vm157_vm3, %v56_v4  ;;  %v59_v11 = vld [vmem:[%s492_s5 + $0x8] sm:$0xf]  ;;  %v58_v12 = vld [vmem:[%s492_s5] sm:$0xff] }
  0x1d   :  { %342 = vmatprep.subr.mxu0 %v415_v0  ;;  %349 = vmatprep.subr.mxu1 %v415_v0  ;;  %v325_v13 = vld [vmem:[%s491_s4] ss:$0 sm:$0xff] }
  0x1e   :  { %343 = vmatpush3.msra.mxu0 %v52_v2  ;;  %350 = vmatpush3.msra.mxu1 %v55_v5  ;;  %v328_v18 = vld [vmem:[%s493_s6] ss:$0 sm:$0xff] }
  0x1f   :  { %345 = vmatmul.mubr.msk.f32.vlgmr.msra.gmra.mxu0 %vm68_vm2, %v61_v3  ;;  %354 = vmatprep.subr.mxu0 %v415_v0 }
  0x20   :  { %358 = vmatprep.mubr.msk.f32.mxu0 %vm416_vm0, %v415_v0  ;;  %355 = vmatpush3.msk.msra.mxu0 %vm157_vm3, %v59_v11 }
  0x21   :  { %356 = vmatprep.subr.mxu0 %v415_v0 }
  0x22   :  { %357 = vmatpush3.msra.mxu0 %v58_v12 }
  0xdf   :  { %v142_v7 = vpop.f32.mrf.mxu0 }
  0xe0   :  { %v143_v8 = vadd.f32 %v322_v6, %v142_v7 }
  0xe1   :  { %v346_v9 = vpop.f32.mrf.mxu0 }
  0xe2   :  { %v146_v10 = vmax.f32 %v143_v8, 0.0 }
  0xe4   :  { %352 = vmatmul.mubr.msk.f32.vlgmr.msra.gmra.mxu1 %vm153_vm4, %v146_v10 }
 0x1a4   :  { %v227_v14 = vpop.f32.mrf.mxu1 }
 0x1a5   :  { %v228_v15 = vadd.f32 %v325_v13, %v227_v14 }
 0x1a6   :  { %v353_v16 = vpop.f32.mrf.mxu1 }
 0x1a7   :  { %v231_v17 = vmax.f32 %v228_v15, 0.0 }
 0x1a9   :  { %359 = vmatmul.mubr.msk.f32.vlgmr.msra.gmra.mxu0 %vm153_vm4, %v231_v17 }
 0x269   :  { %v310_v19 = vpop.f32.mrf.mxu0 }
 0x26a   :  { %v311_v20 = vadd.f32 %v328_v18, %v310_v19 }
 0x26b   :  { %v360_v21 = vpop.f32.mrf.mxu0 }
 0x26c   :  { %315 = vst.msk [vmem:[%s494_s7] sm:$0xff] %vm314_vm5, %v311_v20 }
 0x26d   :  { %320 = vsyncpa [#allocation3], 1 }
 0x26e   :  { %321 = vsyncpa [#allocation5], 1 }

</bundles_post_ra>
